<compile_context>
chip_gen: v6e
topology: v6e:2x2x1
jax: 0.10.0
libtpu: 0.0.40
codegen_flags: <defaults>
</compile_context>

<pallas_src>
import functools

import jax
import jax.numpy as jnp
from jax.experimental import pallas as pl
from jax.experimental.pallas import tpu as pltpu


def _tsp_kernel(x_ref, o_ref, s1_ref, s2_ref, *, total_frames):
    """One (Bt, C, Tt) input block; accumulates sums across the T grid axis."""
    k = pl.program_id(1)

    @pl.when(k == 0)
    def _init():
        s1_ref[...] = jnp.zeros_like(s1_ref)
        s2_ref[...] = jnp.zeros_like(s2_ref)

    x = x_ref[...].astype(jnp.float32)              # (Bt, C, Tt)
    s1_ref[...] += jnp.sum(x, axis=-1)              # (Bt, C)
    s2_ref[...] += jnp.sum(x * x, axis=-1)          # (Bt, C)

    @pl.when(k == pl.num_programs(1) - 1)
    def _finalize():
        T = total_frames
        inv_t = 1.0 / T
        # torch.var(unbiased) is NaN for a single frame; mirror that.
        inv_tm1 = 1.0 / (T - 1) if T > 1 else float("nan")
        s1 = s1_ref[...]
        mean = s1 * inv_t                            # (Bt, C)
        var = (s2_ref[...] - s1 * mean) * inv_tm1    # (Bt, C), unbiased
        o_ref[:, 0, :] = mean.astype(o_ref.dtype)
        o_ref[:, 1, :] = var.astype(o_ref.dtype)


def _pick_tiles(B, C, T, itemsize):
    """Choose (Bt, Tt) so the input tile is big (multi-MiB) but VMEM-safe
    on every generation (v7x has only 64 MiB physical VMEM)."""
    tile_budget = 8 * 1024 * 1024  # bytes per input tile (Pallas double-buffers)

    # --- T tiling: prefer full T; otherwise a multiple-of-128 divisor of T.
    row_bytes = C * T * itemsize
    if row_bytes <= tile_budget:
        Tt = T
    else:
        Tt = None
        t = max((tile_budget // (C * itemsize)) // 128 * 128, 0)
        while t >= 128:
            if T % t == 0:
                Tt = t
                break
            t -= 128
        if Tt is None:
            # No clean 128-multiple divisor; fall back to full T (rare).
            Tt = T

    # --- Bt: largest divisor of B whose tile fits the budget.
    Bt = 1
    for cand in range(B, 0, -1):
        if B % cand == 0 and cand * C * Tt * itemsize <= tile_budget:
            Bt = cand
            break
    # Keep >=2 batch grid steps when possible (feeds both TCs on v7x).
    if Bt == B and B > 1:
        for cand in range(B // 2, 0, -1):
            if B % cand == 0:
                Bt = cand
                break
    return Bt, Tt


def temporal_statistics_pooling(x):
    """x: (B, C, T) -> (B, 2*C) = concat([mean_t, var_t(unbiased)], axis=1)."""
    B, C, T = x.shape
    itemsize = jnp.dtype(x.dtype).itemsize
    Bt, Tt = _pick_tiles(B, C, T, itemsize)
    nb = B // Bt
    nt = pl.cdiv(T, Tt)  # exact: Tt divides T, or Tt == T

    out3 = pl.pallas_call(
        functools.partial(_tsp_kernel, total_frames=T),
        out_shape=jax.ShapeDtypeStruct((B, 2, C), x.dtype),
        grid_spec=pltpu.PrefetchScalarGridSpec(
            num_scalar_prefetch=0,
            grid=(nb, nt),
            in_specs=[pl.BlockSpec((Bt, C, Tt), lambda b, k: (b, 0, k))],
            out_specs=pl.BlockSpec((Bt, 2, C), lambda b, k: (b, 0, 0)),
            scratch_shapes=[
                pltpu.VMEM((Bt, C), jnp.float32),  # s1 = sum(x)
                pltpu.VMEM((Bt, C), jnp.float32),  # s2 = sum(x*x)
            ],
        ),
        compiler_params=pltpu.CompilerParams(
            dimension_semantics=("parallel", "arbitrary"),
            vmem_limit_bytes=32 * 1024 * 1024,
        ),
        cost_estimate=pl.CostEstimate(
            flops=3 * B * C * T,
            transcendentals=0,
            bytes_accessed=B * C * T * itemsize + B * 2 * C * itemsize,
        ),
    )(x)

    # (B, 2, C) -> (B, 2C): row b is [mean(b, :), var(b, :)], same as the concat.
    return out3.reshape(B, 2 * C)


def _reference(x):
    mean = jnp.mean(x, axis=2)
    var = jnp.var(x, axis=2, ddof=1)  # unbiased, like torch.var default
    return jnp.concatenate((mean, var), axis=1)


if __name__ == "__main__":
    key = jax.random.PRNGKey(0)

    # Small shape consistent with the module: (batch, channels, frames).
    B, C, T = 2, 4, 16
    x = jax.random.normal(key, (B, C, T), dtype=jnp.float32)
    out = jax.block_until_ready(temporal_statistics_pooling(x))
    ref = _reference(x)
    assert out.shape == (B, 2 * C), out.shape
    assert jnp.allclose(out, ref, atol=1e-5, rtol=1e-5), (out, ref)

    # Secondary check exercising multi-batch blocks / lane-aligned channels.
    B2, C2, T2 = 4, 128, 200
    x2 = jax.random.normal(jax.random.PRNGKey(1), (B2, C2, T2), dtype=jnp.float32)
    out2 = jax.block_until_ready(temporal_statistics_pooling(x2))
    ref2 = _reference(x2)
    assert out2.shape == (B2, 2 * C2), out2.shape
    assert jnp.allclose(out2, ref2, atol=1e-4, rtol=1e-4)

    print("KERNEL_OK")
</pallas_src>

<mosaic_0001>
module attributes {stable_mosaic.version = 11 : i64} {
  func.func @_tsp_kernel(%arg0: i32, %arg1: i32, %arg2: memref<1x4x16xf32, #tpu.memory_space<vmem>>, %arg3: memref<1x2x4xf32, #tpu.memory_space<vmem>>, %arg4: memref<1x4xf32, #tpu.memory_space<vmem>>, %arg5: memref<1x4xf32, #tpu.memory_space<vmem>>) attributes {dimension_semantics = [#tpu.dimension_semantics<parallel>, #tpu.dimension_semantics<arbitrary>], iteration_bounds = array<i64: 2, 1>, scalar_prefetch = 0 : i64, scratch_operands = 2 : i64, tpu.core_type = #tpu.core_type<tc>, window_params = [{transform_indices = @transform_0, window_bounds = array<i64: 1, 4, 16>}, {transform_indices = @transform_1, window_bounds = array<i64: 1, 2, 4>}]} {
    %c0_i32 = arith.constant 0 : i32
    %0 = arith.cmpi eq, %arg1, %c0_i32 : i32
    %1 = arith.extui %0 : i1 to i32
    %c0_i32_0 = arith.constant 0 : i32
    %2 = arith.cmpi ne, %1, %c0_i32_0 : i32
    scf.if %2 {
      %cst_14 = arith.constant 0.000000e+00 : f32
      %16 = vector.broadcast %cst_14 : f32 to vector<1x4xf32>
      %c0_15 = arith.constant 0 : index
      %c0_16 = arith.constant 0 : index
      %17 = vector.load %arg4[%c0_15, %c0_16] : memref<1x4xf32, #tpu.memory_space<vmem>>, vector<1x4xf32>
      tpu.vector_store %arg4[%c0_15, %c0_16], %16 {strides = array<i32>} : memref<1x4xf32, #tpu.memory_space<vmem>>, vector<1x4xf32>,
      %cst_17 = arith.constant 0.000000e+00 : f32
      %18 = vector.broadcast %cst_17 : f32 to vector<1x4xf32>
      %c0_18 = arith.constant 0 : index
      %c0_19 = arith.constant 0 : index
      %19 = vector.load %arg5[%c0_18, %c0_19] : memref<1x4xf32, #tpu.memory_space<vmem>>, vector<1x4xf32>
      tpu.vector_store %arg5[%c0_18, %c0_19], %18 {strides = array<i32>} : memref<1x4xf32, #tpu.memory_space<vmem>>, vector<1x4xf32>,
    } else {
    }
    %c0 = arith.constant 0 : index
    %c0_1 = arith.constant 0 : index
    %c0_2 = arith.constant 0 : index
    %3 = vector.load %arg2[%c0, %c0_1, %c0_2] : memref<1x4x16xf32, #tpu.memory_space<vmem>>, vector<1x4x16xf32>
    %c0_3 = arith.constant 0 : index
    %c0_4 = arith.constant 0 : index
    %4 = vector.load %arg4[%c0_3, %c0_4] : memref<1x4xf32, #tpu.memory_space<vmem>>, vector<1x4xf32>
    %cst = arith.constant dense<0.000000e+00> : vector<1x4xf32>
    %5 = vector.multi_reduction <add>, %3, %cst [2] : vector<1x4x16xf32> to vector<1x4xf32>
    %6 = arith.addf %4, %5 : vector<1x4xf32>
    %c0_5 = arith.constant 0 : index
    %c0_6 = arith.constant 0 : index
    %7 = vector.load %arg4[%c0_5, %c0_6] : memref<1x4xf32, #tpu.memory_space<vmem>>, vector<1x4xf32>
    tpu.vector_store %arg4[%c0_5, %c0_6], %6 {strides = array<i32>} : memref<1x4xf32, #tpu.memory_space<vmem>>, vector<1x4xf32>,
    %c0_7 = arith.constant 0 : index
    %c0_8 = arith.constant 0 : index
    %8 = vector.load %arg5[%c0_7, %c0_8] : memref<1x4xf32, #tpu.memory_space<vmem>>, vector<1x4xf32>
    %9 = arith.mulf %3, %3 : vector<1x4x16xf32>
    %cst_9 = arith.constant dense<0.000000e+00> : vector<1x4xf32>
    %10 = vector.multi_reduction <add>, %9, %cst_9 [2] : vector<1x4x16xf32> to vector<1x4xf32>
    %11 = arith.addf %8, %10 : vector<1x4xf32>
    %c0_10 = arith.constant 0 : index
    %c0_11 = arith.constant 0 : index
    %12 = vector.load %arg5[%c0_10, %c0_11] : memref<1x4xf32, #tpu.memory_space<vmem>>, vector<1x4xf32>
    tpu.vector_store %arg5[%c0_10, %c0_11], %11 {strides = array<i32>} : memref<1x4xf32, #tpu.memory_space<vmem>>, vector<1x4xf32>,
    %c0_i32_12 = arith.constant 0 : i32
    %13 = arith.cmpi eq, %arg1, %c0_i32_12 : i32
    %14 = arith.extui %13 : i1 to i32
    %c0_i32_13 = arith.constant 0 : i32
    %15 = arith.cmpi ne, %14, %c0_i32_13 : i32
    scf.if %15 {
      %c0_14 = arith.constant 0 : index
      %c0_15 = arith.constant 0 : index
      %16 = vector.load %arg4[%c0_14, %c0_15] : memref<1x4xf32, #tpu.memory_space<vmem>>, vector<1x4xf32>
      %cst_16 = arith.constant 6.250000e-02 : f32
      %17 = vector.broadcast %cst_16 : f32 to vector<1x4xf32>
      %18 = arith.mulf %16, %17 : vector<1x4xf32>
      %c0_17 = arith.constant 0 : index
      %c0_18 = arith.constant 0 : index
      %19 = vector.load %arg5[%c0_17, %c0_18] : memref<1x4xf32, #tpu.memory_space<vmem>>, vector<1x4xf32>
      %20 = arith.mulf %16, %18 : vector<1x4xf32>
      %21 = arith.subf %19, %20 : vector<1x4xf32>
      %cst_19 = arith.constant 0.0666666701 : f32
      %22 = vector.broadcast %cst_19 : f32 to vector<1x4xf32>
      %23 = arith.mulf %21, %22 : vector<1x4xf32>
      %c0_20 = arith.constant 0 : index
      %c0_21 = arith.constant 0 : index
      %c0_22 = arith.constant 0 : index
      %24 = vector.load %arg3[%c0_20, %c0_21, %c0_22] : memref<1x2x4xf32, #tpu.memory_space<vmem>>, vector<1x1x4xf32>
      %25 = vector.shape_cast %24 : vector<1x1x4xf32> to vector<1x4xf32>
      %26 = vector.shape_cast %18 : vector<1x4xf32> to vector<1x1x4xf32>
      tpu.vector_store %arg3[%c0_20, %c0_21, %c0_22], %26 {strides = array<i32>} : memref<1x2x4xf32, #tpu.memory_space<vmem>>, vector<1x1x4xf32>,
      %c0_23 = arith.constant 0 : index
      %c1 = arith.constant 1 : index
      %c0_24 = arith.constant 0 : index
      %27 = vector.load %arg3[%c0_23, %c1, %c0_24] : memref<1x2x4xf32, #tpu.memory_space<vmem>>, vector<1x1x4xf32>
      %28 = vector.shape_cast %27 : vector<1x1x4xf32> to vector<1x4xf32>
      %29 = vector.shape_cast %23 : vector<1x4xf32> to vector<1x1x4xf32>
      tpu.vector_store %arg3[%c0_23, %c1, %c0_24], %29 {strides = array<i32>} : memref<1x2x4xf32, #tpu.memory_space<vmem>>, vector<1x1x4xf32>,
    } else {
    }
    return
  }
  func.func @transform_0(%arg0: i32, %arg1: i32) -> (i32, i32, i32) {
    %c0_i32 = arith.constant 0 : i32
    %c0_i32_0 = arith.constant 0 : i32
    return %arg0, %c0_i32, %arg1 : i32, i32, i32
  }
  func.func @transform_1(%arg0: i32, %arg1: i32) -> (i32, i32, i32) {
    %c0_i32 = arith.constant 0 : i32
    %c0_i32_0 = arith.constant 0 : i32
    %c0_i32_1 = arith.constant 0 : i32
    return %arg0, %c0_i32, %c0_i32_0 : i32, i32, i32
  }
}

</mosaic_0001>

<bundles_post_ra>
// kernel: tpu_custom_call.1
= control target key start
LH: loop header
LB: loop body
LE: loop exit
PB: predicated region body
PF: predicated region fallthrough
CT: control target
= control target key end

     0   :  { %6 = vsyncpa [#allocation5], 0  ;;  %s748_s0 = inlined_call_operand.hbm [shape: f32[2,4,16], index: 0, kind: input, shape index: {}]   ;;  %s749_s1 = inlined_call_operand.hbm [shape: f32[2,2,4], index: 1, kind: output, shape index: {}]  }
   0x1   :  { %8 = vsyncpa [#allocation5 + $0x1], 0 }
   0x2   :  { %9 = vsyncpa [#allocation6], 0 }
   0x3   :  { %11 = vsyncpa [#allocation6 + $0x1], 0  ;;  %s607_s6 = smov 0   ;;  %s609_s7 = smov 0  }
   0x4   :  { %s611_s8 = smov 0   ;;  %s613_s9 = smov 0  }
   0x5   :  { %s615_s10 = smov 0   ;;  %s617_s11 = smov 0  }
   0x6 LB: > { %s402_s12 = sadd.s32 4294967295, %s590_s11   ;;  %s403_s13 = sadd.s32 4294967294, %s590_s11   ;;  %s590_s11 = sphi %s617_s11, %s17_s11   ;;  %s586_s10 = sphi %s615_s10, %s761_s10   ;;  %s582_s9 = sphi %s613_s9, %s760_s9   ;;  %s578_s8 = sphi %s611_s8, %s759_s8   ;;  %s574_s7 = sphi %s609_s7, %s758_s7   ;;  %s570_s6 = sphi %s607_s6, %s757_s6  }
   0x7   : > { %s29_s14 = sadd.s32 1, %s586_s10  ;;  %s38_s15 = sadd.s32 1, %s578_s8 }
   0x8   : > { %p31_p0 = scmp.ge.s32.totalorder %s29_s14, 2  ;;  %p45_p1 = scmp.ne.s32.totalorder %s578_s8, %s574_s7 }
   0x9   : > { %p46_p2 = scmp.eq.s32.totalorder %s590_s11, 0  ;;  %p51_p3 = scmp.ne.s32.totalorder %s574_s7, %s570_s6 }
   0xa   : > { %s763_s14 = smov (%p31_p0, %s29_s14), 0  ;;  %p52_p5 = scmp.eq.s32.totalorder %s402_s12, 0 }
   0xb   : > { %p648_p4 = por %p46_p2, %p45_p1  ;;  %s33_s17 = ssub.s32 %s586_s10, %s763_s14 }
   0xc   : > { %p75_p6 = scmp.eq.s32.totalorder %s402_s12, 1  ;;  %p36_p7 = scmp.eq.s32.totalorder %s33_s17, 0 }
   0xd   : > { %p654_p8 = por %p52_p5, %p51_p3  ;;  %p81_p10 = scmp.eq.s32.totalorder %s403_s13, 1 }
   0xe   : > { %p658_p9 = por %p75_p6, %p45_p1  ;;  %p427_p13 = scmp.lt.s32.totalorder %s590_s11, 2 }
   0xf   : > { %s663_s20 = scalar_select %p36_p7, %s578_s8, %s38_s15  }
  0x10   : > { %p665_p11 = por %p81_p10, %p51_p3  ;;  %s101_s22 = sand.u32 1, %s578_s8  }
  0x11   : > { %s406_s23 = sshll.u32 %s101_s22, 2  ;;  %s407_s24 = sshll.u32 %s586_s10, 6 }
  0x12   : > { %s753_s21 = scalar_select %p665_p11, 1, 0 }
  0x13   : > { %s111_s27 = scalar_lea.hbm %s748_s0, %s407_s24  ;;  %s105_s28 = scalar_lea.vmem [#allocation4], %s406_s23 }
  0x14   : > { %s113_s29 = sshll.u32 %s105_s28, 4  ;;  %p678_p0 = pnand %p427_p13, %p648_p4  ;;  %s114_s29 = int_to_ptr.vmem [resolvable:$true] %s113_s29 }
  0x15   : > { %p408_p1 = scmp.ge.s32.totalorder %s590_s11, 1  ;;  %p118_p2 = scmp.lt.s32.totalorder %s590_s11, 3 }
  0x16   : > { %s102_s2 = scalar_lea.sflag [#allocation5], %s101_s22  ;;  %p484_p3 = pneg %p678_p0 }
  0x17   : > { %s495_s3 = scalar_lea.vmem %s114_s29, 64  ;;  %s592_s4 = smov [#allocation4]  }
  0x18   : > { %p496_p5 = scmp.ne.s32.totalorder %s114_s29, %s495_s3  ;;  %s500_s5 = sshll.u32 %s592_s4, 4  ;;  %s501_s5 = int_to_ptr.vmem [resolvable:$false] %s500_s5 }
  0x19   : > { %s502_s12 = scalar_lea.vmem %s501_s5, 128  ;;  %p503_p10 = scmp.lt.s32.totalorder %s114_s29, %s501_s5 }
  0x1a   : > { %p498_p6 = pnand %p496_p5, %p484_p3  ;;  %p504_p12 = scmp.lt.s32.totalorder %s502_s12, %s495_s3 }
  0x1c   : > { %p499_p7 = pneg %p498_p6  ;;  %p505_p4 = por %p504_p12, %p503_p10 }
  0x1e   : > { %p506_p13 = pnand %p505_p4, %p499_p7 }
  0x20   : > { %509 = shalt.err (!%p506_p13)
}
  0x21   : > { %422 = dma.hbm_to_vmem [thread:$0]  (!%p678_p0), %s111_s27, 64, %s114_s29, %s102_s2  }
  0x22   : > { %p119_p11 = pnand %p408_p1, %p118_p2 }
  0x23   : > { %s693_s13 = sand.u32 (!%p119_p11), 1, %s574_s7  }
  0x24   : > { %122 = sbr.rel (%p119_p11) target bundleno = 354 (0x162), region = 24  ;;  %s409_s15 = sshll.u32 (!%p119_p11), %s693_s13, 2 }
  0x25   : > { %s125_s16 = scalar_lea.sflag (!%p119_p11), [#allocation5], %s693_s13  ;;  %s128_s17 = scalar_lea.vmem (!%p119_p11), [#allocation4], %s409_s15 }
  0x29   : > { %561 = dma.done.wait (%p654_p8), %s125_s16, 64  }
  0x2a   : > { %563 = vsyncadd (%p654_p8), %s125_s16, 4294967232  ;;  %vm156_vm0 = vcmask 125952   ;;  %v154_v0 = vld [vmem:[%s128_s17] sm:$0xf]  ;;  %v593_v4 = vmov 0   ;;  %v161_v5 = vlaneseq  ;;  %vm151_vm1 = vcmask 24576  }
  0x2b   : > { %v157_v1 = vsel %vm156_vm0, %v154_v0, 0.0  ;;  %v229_v2 = vmul.f32 %v154_v0, %v154_v0  ;;  %480 = vset.pattern.permute.xlu1 %v593_v4  ;;  %481 = vset.pattern.permute.xlu0 %v593_v4  ;;  %v594_v8 = vmov 0.0   ;;  %v595_v10 = vmov 1966171168   ;;  %s410_s18 = sshll.u32 %s693_s13, 1  ;;  %s412_s23 = sshll.u32 %s582_s9, 5 }
  0x2c   : > { %158 = vadd.xlane.f32.xlu0 %v157_v1  ;;  %v162_v6 = vshrl.u32 %v161_v5, 7  ;;  %v205_v7 = vand.u32 127, %v161_v5  ;;  %152 = vst.msk [vmem:[#allocation2] sm:$0x1] %vm151_vm1, %v594_v8  ;;  %153 = vst.msk [vmem:[#allocation3] sm:$0x1] %vm151_vm1, %v594_v8  ;;  %v180_v11 = vunpack.c.l.s4 %v595_v10  ;;  %s321_s27 = scalar_lea.hbm %s749_s1, %s412_s23 }
  0x2d   : > { %v230_v3 = vsel %vm156_vm0, %v229_v2, 0.0  ;;  %s146_s22 = scalar_lea.vmem [#allocation7], %s410_s18  ;;  %s310_s28 = scalar_lea.sflag [#allocation6], %s693_s13 }
  0x2e   : > { %v208_v9 = vsub.s32 %v205_v7, %v162_v6  ;;  %v163_v12 = vsub.s32 0, %v162_v6  ;;  %v167_v13 = vsub.s32 1, %v162_v6  ;;  %v171_v14 = vsub.s32 2, %v162_v6  ;;  %s323_s24 = sshll.u32 %s146_s22, 4  ;;  %s596_s30 = smov [#allocation7]   ;;  %s324_s24 = int_to_ptr.vmem [resolvable:$true] %s323_s24 }
  0x2f   : > { %v175_v15 = vsub.s32 3, %v162_v6  ;;  %v181_v16 = vunpack.c.0.s8 %v180_v11  ;;  %s510_s29 = scalar_lea.vmem %s324_s24, 32  ;;  %s514_s2 = sshll.u32 %s596_s30, 4  ;;  %s515_s2 = int_to_ptr.vmem [resolvable:$false] %s514_s2 }
  0x30   : > { %231 = vadd.xlane.f32.xlu0 %v230_v3  ;;  %p511_p8 = scmp.ne.s32.totalorder %s324_s24, %s510_s29  ;;  %s516_s9 = scalar_lea.vmem %s515_s2, 64 }
  0x31   : > { %v184_v22 = vsub.s32 %v181_v16, %v162_v6  ;;  %p517_p0 = scmp.lt.s32.totalorder %s324_s24, %s515_s2  ;;  %p518_p1 = scmp.lt.s32.totalorder %s516_s9, %s510_s29 }
  0x32   : > { %p512_p11 = pnand %p511_p8, %p658_p9 }
  0x33   : > { %v155_v43 = vld [vmem:[#allocation2] sm:$0x1]  ;;  %v228_v49 = vld [vmem:[#allocation3] sm:$0x1]  ;;  %p519_p2 = por %p518_p1, %p517_p0 }
  0x34   : > { %p513_p12 = pneg %p512_p11 }
  0x36   : > { %p520_p3 = pnand %p519_p2, %p513_p12 }
  0xb5   : > { %v159_v17 = vpop.xlane.xlu0 %158 }
  0xb6   : > { %v164_v18 = vrot.slane %v159_v17, %v163_v12  ;;  %v168_v19 = vrot.slane %v159_v17, %v167_v13  ;;  %v172_v20 = vrot.slane %v159_v17, %v171_v14  ;;  %v176_v21 = vrot.slane %v159_v17, %v175_v15 }
  0xb8   : > { %v177_v23 = vcombine.low %v164_v18, %v168_v19  ;;  %v178_v24 = vcombine.low %v172_v20, %v176_v21 }
  0xb9   : > { %v232_v25 = vpop.xlane.xlu0 %231 }
  0xba   : > { %v237_v26 = vrot.slane %v232_v25, %v163_v12  ;;  %v241_v27 = vrot.slane %v232_v25, %v167_v13  ;;  %v245_v28 = vrot.slane %v232_v25, %v171_v14  ;;  %v249_v29 = vrot.slane %v232_v25, %v175_v15 }
  0xbb   : > { %v185_v30 = vrot.slane %v177_v23, %v184_v22  ;;  %v192_v31 = vrot.slane %v178_v24, %v184_v22 }
  0xbc   : > { %v250_v32 = vcombine.low %v237_v26, %v241_v27  ;;  %v251_v33 = vcombine.low %v245_v28, %v249_v29 }
  0xbd   : > { %v193_v34 = vcombine.low %v185_v30, %v192_v31 }
  0xbe   : > { %v258_v35 = vrot.slane %v250_v32, %v184_v22  ;;  %v265_v36 = vrot.slane %v251_v33, %v184_v22 }
  0xbf   : > { %v200_v37 = vrot.slane %v193_v34, %v184_v22 }
  0xc0   : > { %v266_v38 = vcombine.low %v258_v35, %v265_v36 }
  0xc1   : > { %202 = vperm.xlu1 %480, %v200_v37  }
  0xc2   : > { %v273_v39 = vrot.slane %v266_v38, %v184_v22 }
  0xc5   : > { %275 = vperm.xlu1 %480, %v273_v39  }
 0x13c   : > { %v203_v40 = vpop.permute.xlu1 %202 }
 0x13d   : > { %v209_v41 = vrot.slane %v203_v40, %v208_v9 }
 0x13f   : > { %v216_v42 = vrot.slane %v209_v41, %v184_v22 }
 0x140   : > { %v276_v44 = vpop.permute.xlu1 %275 }
 0x141   : > { %v223_v45 = vrot.slane %v216_v42, %v184_v22  ;;  %v280_v46 = vrot.slane %v276_v44, %v208_v9 }
 0x143   : > { %v225_v47 = vadd.f32 %v223_v45, %v155_v43  ;;  %v287_v48 = vrot.slane %v280_v46, %v184_v22 }
 0x145   : > { %227 = vst.msk [vmem:[#allocation2] sm:$0x1] %vm151_vm1, %v225_v47  ;;  %v294_v50 = vrot.slane %v287_v48, %v184_v22 }
 0x147   : > { %v296_v51 = vadd.f32 %v294_v50, %v228_v49 }
 0x149   : > { %297 = vst.msk [vmem:[#allocation3] sm:$0x1] %vm151_vm1, %v296_v51 }
 0x14c   : > { %v301_v52 = vld [vmem:[#allocation2] sm:$0x1] }
 0x14d   : > { %v302_v53 = vmul.f32 0.0625, %v301_v52 }
 0x14f   : > { %v304_v54 = vmul.f32 %v302_v53, %v301_v52  ;;  %307 = vst.msk [vmem:[%s146_s22] sm:$0x1] %vm151_vm1, %v302_v53 }
 0x150   : > { %v303_v55 = vld [vmem:[#allocation3] sm:$0x1] }
 0x151   : > { %v305_v56 = vsub.f32 %v303_v55, %v304_v54 }
 0x153   : > { %v306_v57 = vmul.f32 0.06666667, %v305_v56 }
 0x155   : > { %308 = vst.msk [vmem:[%s146_s22 + $0x1] sm:$0x1] %vm151_vm1, %v306_v57 }
 0x156   : > { %523 = shalt.err (!%p520_p3)
}
 0x157   : > { %s524_s3 = scalar_lea.hbm %s321_s27, 32  ;;  %s528_s12 = scalar_lea.hbm %s749_s1, 64 }
 0x158   : > { %p525_p5 = scmp.ne.s32.totalorder %s321_s27, %s524_s3  ;;  %p529_p10 = scmp.lt.s32.totalorder %s321_s27, %s749_s1 }
 0x159   : > { %p530_p4 = scmp.lt.s32.totalorder %s528_s12, %s524_s3 }
 0x15a   : > { %p526_p6 = pnand %p525_p5, %p658_p9 }
 0x15b   : > { %p531_p13 = por %p530_p4, %p529_p10 }
 0x15c   : > { %p527_p7 = pneg %p526_p6 }
 0x15e   : > { %p532_p8 = pnand %p531_p13, %p527_p7 }
 0x160   : > { %535 = shalt.err (!%p532_p8)
}
 0x161   : > { %417 = dma.vmem_to_hbm [thread:$0]  (%p658_p9), %s324_s24, 32, %s321_s27, %s310_s28  }
 0x162 PF: > { %s335_s16 = sand.u32 1, %s570_s6   ;;  %p755_p11 = scmp.ne.s32.totalorder %s753_s21, 0 }
 0x163   : > { %p756_p12 = scmp.ge.s32.totalorder %s590_s11, 2  ;;  %s336_s17 = scalar_lea.sflag [#allocation6], %s335_s16 }
 0x165   : > { %p424_p0 = pnand %p756_p12, %p755_p11 }
 0x167   : > { %p425_p1 = pneg %p424_p0 }
 0x169   : > { %565 = dma.done.wait (%p425_p1), %s336_s17, 32  }
 0x16a   : > { %567 = vsyncadd (%p425_p1), %s336_s17, 4294967264  ;;  %s17_s11 = sadd.s32 1, %s590_s11   ;;  %s757_s6 = smov %s574_s7 }
 0x16b   : > { %p14_p2 = scmp.ge.s32.totalorder %s17_s11, 4   ;;  %s758_s7 = smov %s578_s8 }
 0x16c   : > { %s759_s8 = smov %s663_s20  ;;  %s760_s9 = smov %s586_s10 }
 0x16d   : > { %s761_s10 = smov %s763_s14  ;;  %16 = sbr.rel (!%p14_p2) target bundleno = 6 (0x6), region = 77 }
 0x172   :  { %341 = vsyncpa [#allocation5], 1 }
 0x173   :  { %343 = vsyncpa [#allocation5 + $0x1], 1 }
 0x174   :  { %344 = vsyncpa [#allocation6], 1 }
 0x175   :  { %346 = vsyncpa [#allocation6 + $0x1], 1 }

</bundles_post_ra>
